<compile_context>
chip_gen: v7x
topology: tpu7x:2x2x1
jax: 0.10.0
libtpu: 0.0.40
codegen_flags: <defaults>
</compile_context>

<pallas_src>
import functools

import jax
import jax.numpy as jnp
from jax.experimental import pallas as pl
from jax.experimental.pallas import tpu as pltpu


def _round_up(x, m):
    return ((x + m - 1) // m) * m


# ----------------------------- Pallas kernels ------------------------------

def _matmul_stats_kernel_multi_k(a_ref, b_ref, o_ref, sum_ref, sq_ref, acc_ref):
    """(tm, tn) conv-output tile accumulated over the K grid axis (axis 2).

    a_ref : (tm, tk) bf16 patch tile
    b_ref : (tk, tn) bf16 weight tile
    o_ref : (tm, tn) bf16 conv output tile
    sum_ref, sq_ref : (1, 1, tn) f32 partial BN stats (row-sum / row-sum-sq)
    acc_ref : (tm, tn) f32 VMEM accumulator scratch
    """
    k = pl.program_id(2)

    @pl.when(k == 0)
    def _():
        acc_ref[...] = jnp.zeros_like(acc_ref)

    acc_ref[...] += jnp.dot(a_ref[...], b_ref[...],
                            preferred_element_type=jnp.float32)

    @pl.when(k == pl.num_programs(2) - 1)
    def _():
        acc = acc_ref[...]
        o_ref[...] = acc.astype(o_ref.dtype)
        sum_ref[...] = jnp.sum(acc, axis=0)[None, None, :]
        sq_ref[...] = jnp.sum(acc * acc, axis=0)[None, None, :]


def _matmul_stats_kernel_single_k(a_ref, b_ref, o_ref, sum_ref, sq_ref):
    """Whole-K (tm, tn) tile: no K grid axis, no accumulator scratch."""
    acc = jnp.dot(a_ref[...], b_ref[...], preferred_element_type=jnp.float32)
    o_ref[...] = acc.astype(o_ref.dtype)
    sum_ref[...] = jnp.sum(acc, axis=0)[None, None, :]
    sq_ref[...] = jnp.sum(acc * acc, axis=0)[None, None, :]


def _bn_relu_kernel(x_ref, scale_ref, bias_ref, o_ref):
    # x_ref: (tm, tn) bf16 conv output; scale/bias: (1, tn) f32; o_ref: f32.
    x = x_ref[...].astype(jnp.float32)
    o_ref[...] = jnp.maximum(x * scale_ref[...] + bias_ref[...], 0.0)


# ------------------------------ host helpers --------------------------------

@functools.lru_cache(maxsize=1)
def _usable_vmem_bytes():
    """Generation-aware usable VMEM budget (with compiler-scratch headroom)."""
    cap = 64 << 20  # conservative default: v7x-sized per-core VMEM
    try:
        info = pltpu.get_tpu_info()
        cap = int(getattr(info, "vmem_capacity_bytes", cap))
    except Exception:
        pass
    # ~100 MiB usable on 128-MiB parts (v5e/v6e), ~51 MiB on 64-MiB parts (v7x).
    return max(16 << 20, min(int(cap * 0.8), cap - (8 << 20)))


def _pick_tiles(m, k_pad, o_pad):
    """Pick (tm, tn, tk, m_pad) for the conv matmul, sized to the VMEM cap."""
    budget = _usable_vmem_bytes()

    # Single O tile when it fits so the much larger A stream is read once.
    if o_pad <= 1024:
        tn = o_pad
    elif o_pad % 512 == 0:
        tn = 512
    elif o_pad % 256 == 0:
        tn = 256
    else:
        tn = 128

    # Whole-K tile (drops the K grid axis + acc scratch) when reasonably small.
    if k_pad <= 2048:
        tk = k_pad
    elif k_pad % 512 == 0:
        tk = 512
    elif k_pad % 256 == 0:
        tk = 256
    else:
        tk = 128

    m_ceil = _round_up(m, 128)
    tm = 128
    for cand in (2048, 1024, 512, 256, 128):
        if cand > m_ceil and cand != 128:
            continue  # don't over-pad M beyond one tile
        need = (2 * cand * tk * 2      # A, bf16, double buffered
                + 2 * tk * tn * 2      # B, bf16, double buffered
                + cand * tn * 4        # f32 accumulator scratch
                + 2 * cand * tn * 2    # bf16 output, double buffered
                + 4 * tn * 4           # stats tiles
                + (2 << 20))           # slack
        if need <= budget:
            tm = cand
            break

    # Keep >= 2 grid blocks when possible so both v7x TensorCores get work.
    no = o_pad // tn
    while tm > 128 and (_round_up(m, tm) // tm) * no < 2:
        tm //= 2

    m_pad = _round_up(m, tm)
    return tm, tn, tk, m_pad


def _im2col_bf16(x_nhwc, kh, kw, stride, padding, dilation, oh, ow,
                 m_pad, k_pad):
    """(N, H, W, C) f32 -> (m_pad, k_pad) bf16 patches, K ordered (KH*KW, C).

    K is kept in (KH*KW, C) order so the KH*KW-expanded tensor never needs a
    5-D transpose; the matching reorder is applied to the tiny weight instead.
    """
    n, h, w, c = x_nhwc.shape
    xb = x_nhwc.astype(jnp.bfloat16)
    xp = jnp.pad(xb, ((0, 0), (padding, padding), (padding, padding), (0, 0)))
    cols = []
    for i in range(kh):
        for j in range(kw):
            r0, c0 = i * dilation, j * dilation
            cols.append(xp[:, r0:r0 + stride * oh:stride,
                           c0:c0 + stride * ow:stride, :])   # (N, OH, OW, C)
    patches = jnp.stack(cols, axis=3).reshape(n * oh * ow, kh * kw * c)
    m, k = patches.shape
    return jnp.pad(patches, ((0, m_pad - m), (0, k_pad - k)))


# ------------------------------ pallas wrappers ------------------------------

def _pallas_conv_matmul_stats(a, b, tm, tn, tk):
    """a: (m_pad, k_pad) bf16, b: (k_pad, o_pad) bf16 ->
       (conv_out bf16 (m_pad, o_pad), per-M-tile BN sums / sums-of-squares)."""
    m_pad, k_pad = a.shape
    o_pad = b.shape[1]
    nm, no, nk = m_pad // tm, o_pad // tn, k_pad // tk

    need = (2 * tm * tk * 2 + 2 * tk * tn * 2 + tm * tn * 4
            + 2 * tm * tn * 2 + 4 * tn * 4) + (4 << 20)
    vmem_limit = int(min(max(need, 16 << 20), _usable_vmem_bytes()))

    out_shapes = (
        jax.ShapeDtypeStruct((m_pad, o_pad), jnp.bfloat16),
        jax.ShapeDtypeStruct((nm, 1, o_pad), jnp.float32),
        jax.ShapeDtypeStruct((nm, 1, o_pad), jnp.float32),
    )

    if nk == 1:
        kernel = _matmul_stats_kernel_single_k
        dim_sem = ("parallel", "parallel")
        grid_spec = pltpu.PrefetchScalarGridSpec(
            num_scalar_prefetch=0,
            grid=(nm, no),
            in_specs=[
                pl.BlockSpec((tm, tk), lambda i, j: (i, 0)),
                pl.BlockSpec((tk, tn), lambda i, j: (0, j)),
            ],
            out_specs=(
                pl.BlockSpec((tm, tn), lambda i, j: (i, j)),
                pl.BlockSpec((1, 1, tn), lambda i, j: (i, 0, j)),
                pl.BlockSpec((1, 1, tn), lambda i, j: (i, 0, j)),
            ),
        )
    else:
        kernel = _matmul_stats_kernel_multi_k
        dim_sem = ("parallel", "parallel", "arbitrary")
        grid_spec = pltpu.PrefetchScalarGridSpec(
            num_scalar_prefetch=0,
            grid=(nm, no, nk),
            in_specs=[
                pl.BlockSpec((tm, tk), lambda i, j, kk: (i, kk)),
                pl.BlockSpec((tk, tn), lambda i, j, kk: (kk, j)),
            ],
            out_specs=(
                pl.BlockSpec((tm, tn), lambda i, j, kk: (i, j)),
                pl.BlockSpec((1, 1, tn), lambda i, j, kk: (i, 0, j)),
                pl.BlockSpec((1, 1, tn), lambda i, j, kk: (i, 0, j)),
            ),
            scratch_shapes=[pltpu.VMEM((tm, tn), jnp.float32)],
        )

    return pl.pallas_call(
        kernel,
        out_shape=out_shapes,
        grid_spec=grid_spec,
        compiler_params=pltpu.CompilerParams(
            dimension_semantics=dim_sem,
            vmem_limit_bytes=vmem_limit),
    )(a, b)


def _pallas_bn_relu(x_bf16, scale, bias, tm, tn):
    """x: (m_pad, o_pad) bf16; scale/bias: (o_pad,) f32 -> f32 BN-affine+ReLU."""
    m_pad, o_pad = x_bf16.shape
    scale2 = scale.reshape(1, o_pad).astype(jnp.float32)
    bias2 = bias.reshape(1, o_pad).astype(jnp.float32)
    need = 2 * tm * tn * 2 + 2 * tm * tn * 4 + 4 * tn * 4 + (2 << 20)
    vmem_limit = int(min(max(need, 16 << 20), _usable_vmem_bytes()))
    return pl.pallas_call(
        _bn_relu_kernel,
        out_shape=jax.ShapeDtypeStruct((m_pad, o_pad), jnp.float32),
        grid_spec=pltpu.PrefetchScalarGridSpec(
            num_scalar_prefetch=0,
            grid=(m_pad // tm, o_pad // tn),
            in_specs=[
                pl.BlockSpec((tm, tn), lambda i, j: (i, j)),
                pl.BlockSpec((1, tn), lambda i, j: (0, j)),
                pl.BlockSpec((1, tn), lambda i, j: (0, j)),
            ],
            out_specs=pl.BlockSpec((tm, tn), lambda i, j: (i, j)),
        ),
        compiler_params=pltpu.CompilerParams(
            dimension_semantics=("parallel", "parallel"),
            vmem_limit_bytes=vmem_limit),
    )(x_bf16, scale2, bias2)


# ------------------------------ forward pass ---------------------------------

@functools.partial(jax.jit, static_argnames=("stride", "padding", "dilation",
                                             "use_bn", "use_act", "bn_eps"))
def conv_bn_relu_forward(x_nchw, weight, gamma, beta, *,
                         stride=1, padding=1, dilation=1,
                         use_bn=True, use_act=True, bn_eps=1e-5):
    """Forward pass of the `conv` module.

    x_nchw : (N, C, H, W) float32
    weight : (O, C, KH, KW) float32   (groups=1, bias=False)
    gamma, beta : (O,) BatchNorm affine params
    Returns: (N, O, OH, OW) float32
    """
    n, c, h, w = x_nchw.shape
    o, c_w, kh, kw = weight.shape
    assert c_w == c  # TODO(synk): grouped conv (groups != 1) not supported

    eff_kh = dilation * (kh - 1) + 1
    eff_kw = dilation * (kw - 1) + 1
    oh = (h + 2 * padding - eff_kh) // stride + 1
    ow = (w + 2 * padding - eff_kw) // stride + 1
    m = n * oh * ow
    k = kh * kw * c
    k_pad = _round_up(k, 128)
    o_pad = _round_up(o, 128)

    tm, tn, tk, m_pad = _pick_tiles(m, k_pad, o_pad)

    # im2col directly in bf16 with padding folded in (single HBM pass).
    x_nhwc = jnp.transpose(x_nchw, (0, 2, 3, 1))
    a = _im2col_bf16(x_nhwc, kh, kw, stride, padding, dilation,
                     oh, ow, m_pad, k_pad)

    # weight (O, C, KH, KW) -> (KH*KW*C, O), matching the patch K ordering.
    w_mat = jnp.transpose(weight, (2, 3, 1, 0)).reshape(k, o)
    b = jnp.pad(w_mat, ((0, k_pad - k), (0, o_pad - o))).astype(jnp.bfloat16)

    conv_out, sums, sqs = _pallas_conv_matmul_stats(a, b, tm, tn, tk)

    if use_bn:
        # Training-mode BatchNorm2d: biased variance over (N, OH, OW).
        # Padded M rows are exact zeros (zero patches @ zero-padded W), so they
        # contribute nothing to sum/sumsq; divide by the true row count m.
        total_sum = jnp.sum(sums, axis=(0, 1))           # (o_pad,)
        total_sq = jnp.sum(sqs, axis=(0, 1))             # (o_pad,)
        mean = total_sum / m
        # TODO(synk): single-pass E[x^2]-E[x]^2 can cancel for |mean| >> std;
        # switch to per-tile centered sums if exact BN parity is required.
        var = jnp.maximum(total_sq / m - mean * mean, 0.0)
        inv_std = jax.lax.rsqrt(var + bn_eps)
        gamma_p = jnp.pad(gamma.astype(jnp.float32), (0, o_pad - o))
        beta_p = jnp.pad(beta.astype(jnp.float32), (0, o_pad - o))
        scale = gamma_p * inv_std
        bias = beta_p - mean * scale
        # TODO(synk): running_mean/running_var updates of nn.BatchNorm2d are
        # module state and not returned here.
    else:
        scale = jnp.ones((o_pad,), jnp.float32)
        bias = jnp.zeros((o_pad,), jnp.float32)

    if use_act:
        y = _pallas_bn_relu(conv_out, scale, bias, tm, tn)
    else:
        # Rare path: affine only (or identity), tiny JAX glue.
        y = conv_out.astype(jnp.float32) * scale[None, :] + bias[None, :]

    y = y[:m, :o].reshape(n, oh, ow, o)
    # TODO(synk): this final NCHW transpose is an extra full-tensor HBM pass;
    # keep NHWC (channels-last) if the downstream consumer allows it.
    return jnp.transpose(y, (0, 3, 1, 2))


# --------------------------------- demo -------------------------------------

if __name__ == "__main__":
    # conv(in_channels=4, out_channels=8, kernel_size=3, stride=1, padding=1,
    #      bias=False, use_bn=True, use_act=True)
    N, C, H, W = 2, 4, 16, 16
    O, KH, KW = 8, 3, 3
    stride, padding = 1, 1

    key = jax.random.PRNGKey(0)
    kx, kw_ = jax.random.split(key)
    x = jax.random.normal(kx, (N, C, H, W), dtype=jnp.float32)
    weight = 0.1 * jax.random.normal(kw_, (O, C, KH, KW), dtype=jnp.float32)
    gamma = jnp.ones((O,), jnp.float32)   # BatchNorm2d default init
    beta = jnp.zeros((O,), jnp.float32)

    out = conv_bn_relu_forward(x, weight, gamma, beta,
                               stride=stride, padding=padding)
    out = jax.block_until_ready(out)
    assert out.shape == (N, O, H, W), out.shape
    assert bool(jnp.all(jnp.isfinite(out)))
    print("KERNEL_OK")
</pallas_src>

<mosaic_0001>
module attributes {stable_mosaic.version = 11 : i64} {
  func.func @_matmul_stats_kernel_single_k(%arg0: i32, %arg1: i32, %arg2: memref<256x128xbf16, #tpu.memory_space<vmem>>, %arg3: memref<128x128xbf16, #tpu.memory_space<vmem>>, %arg4: memref<256x128xbf16, #tpu.memory_space<vmem>>, %arg5: memref<1x1x128xf32, #tpu.memory_space<vmem>>, %arg6: memref<1x1x128xf32, #tpu.memory_space<vmem>>) attributes {dimension_semantics = [#tpu.dimension_semantics<parallel>, #tpu.dimension_semantics<parallel>], iteration_bounds = array<i64: 2, 1>, scalar_prefetch = 0 : i64, scratch_operands = 0 : i64, tpu.core_type = #tpu.core_type<tc>, window_params = [{transform_indices = @transform_0, window_bounds = array<i64: 256, 128>}, {transform_indices = @transform_1, window_bounds = array<i64: 128, 128>}, {transform_indices = @transform_2, window_bounds = array<i64: 256, 128>}, {transform_indices = @transform_3, window_bounds = array<i64: 1, 1, 128>}, {transform_indices = @transform_4, window_bounds = array<i64: 1, 1, 128>}]} {
    %c0 = arith.constant 0 : index
    %c0_0 = arith.constant 0 : index
    %0 = vector.load %arg2[%c0, %c0_0] : memref<256x128xbf16, #tpu.memory_space<vmem>>, vector<256x128xbf16>
    %c0_1 = arith.constant 0 : index
    %c0_2 = arith.constant 0 : index
    %1 = vector.load %arg3[%c0_1, %c0_2] : memref<128x128xbf16, #tpu.memory_space<vmem>>, vector<128x128xbf16>
    %cst = arith.constant dense<0.000000e+00> : vector<256x128xf32>
    %2 = tpu.matmul %0, %1, %cst {dimension_numbers = #tpu.dot_dimension_numbers<[1], [0], [0], [1], [0, 0, 1, 1], [], []>} : vector<256x128xbf16>, vector<128x128xbf16>, vector<256x128xf32> -> vector<256x128xf32>
    %3 = arith.truncf %2 : vector<256x128xf32> to vector<256x128xbf16>
    %c0_3 = arith.constant 0 : index
    %c0_4 = arith.constant 0 : index
    %4 = vector.load %arg4[%c0_3, %c0_4] : memref<256x128xbf16, #tpu.memory_space<vmem>>, vector<256x128xbf16>
    tpu.vector_store %arg4[%c0_3, %c0_4], %3 {strides = array<i32>} : memref<256x128xbf16, #tpu.memory_space<vmem>>, vector<256x128xbf16>,
    %cst_5 = arith.constant dense<0.000000e+00> : vector<128xf32>
    %5 = vector.multi_reduction <add>, %2, %cst_5 [0] : vector<256x128xf32> to vector<128xf32>
    %6 = vector.shape_cast %5 : vector<128xf32> to vector<1x1x128xf32>
    %c0_6 = arith.constant 0 : index
    %c0_7 = arith.constant 0 : index
    %c0_8 = arith.constant 0 : index
    %7 = vector.load %arg5[%c0_6, %c0_7, %c0_8] : memref<1x1x128xf32, #tpu.memory_space<vmem>>, vector<1x1x128xf32>
    tpu.vector_store %arg5[%c0_6, %c0_7, %c0_8], %6 {strides = array<i32>} : memref<1x1x128xf32, #tpu.memory_space<vmem>>, vector<1x1x128xf32>,
    %8 = arith.mulf %2, %2 : vector<256x128xf32>
    %cst_9 = arith.constant dense<0.000000e+00> : vector<128xf32>
    %9 = vector.multi_reduction <add>, %8, %cst_9 [0] : vector<256x128xf32> to vector<128xf32>
    %10 = vector.shape_cast %9 : vector<128xf32> to vector<1x1x128xf32>
    %c0_10 = arith.constant 0 : index
    %c0_11 = arith.constant 0 : index
    %c0_12 = arith.constant 0 : index
    %11 = vector.load %arg6[%c0_10, %c0_11, %c0_12] : memref<1x1x128xf32, #tpu.memory_space<vmem>>, vector<1x1x128xf32>
    tpu.vector_store %arg6[%c0_10, %c0_11, %c0_12], %10 {strides = array<i32>} : memref<1x1x128xf32, #tpu.memory_space<vmem>>, vector<1x1x128xf32>,
    return
  }
  func.func @transform_0(%arg0: i32, %arg1: i32) -> (i32, i32) {
    %c0_i32 = arith.constant 0 : i32
    %c0_i32_0 = arith.constant 0 : i32
    return %arg0, %c0_i32 : i32, i32
  }
  func.func @transform_1(%arg0: i32, %arg1: i32) -> (i32, i32) {
    %c0_i32 = arith.constant 0 : i32
    %c0_i32_0 = arith.constant 0 : i32
    return %c0_i32, %arg1 : i32, i32
  }
  func.func @transform_2(%arg0: i32, %arg1: i32) -> (i32, i32) {
    %c0_i32 = arith.constant 0 : i32
    return %arg0, %arg1 : i32, i32
  }
  func.func @transform_3(%arg0: i32, %arg1: i32) -> (i32, i32, i32) {
    %c0_i32 = arith.constant 0 : i32
    %c0_i32_0 = arith.constant 0 : i32
    return %arg0, %c0_i32, %arg1 : i32, i32, i32
  }
  func.func @transform_4(%arg0: i32, %arg1: i32) -> (i32, i32, i32) {
    %c0_i32 = arith.constant 0 : i32
    %c0_i32_0 = arith.constant 0 : i32
    return %arg0, %c0_i32, %arg1 : i32, i32, i32
  }
}

module attributes {stable_mosaic.version = 11 : i64} {
  func.func @_bn_relu_kernel(%arg0: i32, %arg1: i32, %arg2: memref<256x128xbf16, #tpu.memory_space<vmem>>, %arg3: memref<1x128xf32, #tpu.memory_space<vmem>>, %arg4: memref<1x128xf32, #tpu.memory_space<vmem>>, %arg5: memref<256x128xf32, #tpu.memory_space<vmem>>) attributes {dimension_semantics = [#tpu.dimension_semantics<parallel>, #tpu.dimension_semantics<parallel>], iteration_bounds = array<i64: 2, 1>, scalar_prefetch = 0 : i64, scratch_operands = 0 : i64, tpu.core_type = #tpu.core_type<tc>, window_params = [{transform_indices = @transform_0, window_bounds = array<i64: 256, 128>}, {transform_indices = @transform_1, window_bounds = array<i64: 1, 128>}, {transform_indices = @transform_2, window_bounds = array<i64: 1, 128>}, {transform_indices = @transform_3, window_bounds = array<i64: 256, 128>}]} {
    %c0 = arith.constant 0 : index
    %c0_0 = arith.constant 0 : index
    %0 = vector.load %arg2[%c0, %c0_0] : memref<256x128xbf16, #tpu.memory_space<vmem>>, vector<256x128xbf16>
    %1 = arith.extf %0 : vector<256x128xbf16> to vector<256x128xf32>
    %c0_1 = arith.constant 0 : index
    %c0_2 = arith.constant 0 : index
    %2 = vector.load %arg3[%c0_1, %c0_2] : memref<1x128xf32, #tpu.memory_space<vmem>>, vector<1x128xf32>
    %3 = vector.broadcast %2 : vector<1x128xf32> to vector<256x128xf32>
    %4 = arith.mulf %1, %3 : vector<256x128xf32>
    %c0_3 = arith.constant 0 : index
    %c0_4 = arith.constant 0 : index
    %5 = vector.load %arg4[%c0_3, %c0_4] : memref<1x128xf32, #tpu.memory_space<vmem>>, vector<1x128xf32>
    %6 = vector.broadcast %5 : vector<1x128xf32> to vector<256x128xf32>
    %7 = arith.addf %4, %6 : vector<256x128xf32>
    %cst = arith.constant 0.000000e+00 : f32
    %8 = vector.broadcast %cst : f32 to vector<256x128xf32>
    %9 = arith.maximumf %7, %8 : vector<256x128xf32>
    %c0_5 = arith.constant 0 : index
    %c0_6 = arith.constant 0 : index
    %10 = vector.load %arg5[%c0_5, %c0_6] : memref<256x128xf32, #tpu.memory_space<vmem>>, vector<256x128xf32>
    tpu.vector_store %arg5[%c0_5, %c0_6], %9 {strides = array<i32>} : memref<256x128xf32, #tpu.memory_space<vmem>>, vector<256x128xf32>,
    return
  }
  func.func @transform_0(%arg0: i32, %arg1: i32) -> (i32, i32) {
    %c0_i32 = arith.constant 0 : i32
    return %arg0, %arg1 : i32, i32
  }
  func.func @transform_1(%arg0: i32, %arg1: i32) -> (i32, i32) {
    %c0_i32 = arith.constant 0 : i32
    %c0_i32_0 = arith.constant 0 : i32
    return %c0_i32, %arg1 : i32, i32
  }
  func.func @transform_2(%arg0: i32, %arg1: i32) -> (i32, i32) {
    %c0_i32 = arith.constant 0 : i32
    %c0_i32_0 = arith.constant 0 : i32
    return %c0_i32, %arg1 : i32, i32
  }
  func.func @transform_3(%arg0: i32, %arg1: i32) -> (i32, i32) {
    %c0_i32 = arith.constant 0 : i32
    return %arg0, %arg1 : i32, i32
  }
}

</mosaic_0001>

<bundles_post_ra>
// kernel: conv_bn_relu_forward.3
= control target key start
LH: loop header
LB: loop body
LE: loop exit
PB: predicated region body
PF: predicated region fallthrough
CT: control target
= control target key end

     0   :  { %s703_s12 = smov 0   ;;  %s705_s13 = smov 0   ;;  %s866_s0 = inlined_call_operand.vmem [shape: bf16[512,128], index: 0, kind: input, shape index: {}]   ;;  %s867_s1 = inlined_call_operand.vmem [shape: f32[1,128], index: 1, kind: input, shape index: {}]   ;;  %s868_s2 = inlined_call_operand.vmem [shape: f32[1,128], index: 2, kind: input, shape index: {}]   ;;  %s869_s3 = inlined_call_operand.vmem [shape: f32[512,128], index: 3, kind: output, shape index: {}]  }
   0x1   :  { %s707_s14 = smov 0  }
   0x2 LB: > { %s25_s15 = sadd.s32 1, %s677_s13  ;;  %p547_p0 = scmp.ge.s32.totalorder %s681_s14, 1  ;;  %s681_s14 = sphi %s707_s14, %s13_s14   ;;  %s677_s13 = sphi %s705_s13, %s871_s13   ;;  %s673_s12 = sphi %s703_s12, %s870_s12  }
   0x3   : > { %p27_p1 = scmp.ge.s32.totalorder %s25_s15, 2  ;;  %p173_p2 = scmp.lt.s32.totalorder %s681_s14, 3 }
   0x5   : > { %s873_s15 = smov (%p27_p1, %s25_s15), 0  ;;  %p174_p3 = pnand %p547_p0, %p173_p2 }
   0x6   : > { %s548_s16 = sshll.u32 (!%p174_p3), %s673_s12, 5  ;;  %v732_v0 = vld [vmem:[%s867_s1] ss:$0 sm:$0xff] (!%p174_p3) }
   0x7   : > { %177 = sbr.rel (%p174_p3) target bundleno = 54 (0x36), region = 32  ;;  %p210_p4 = scmp.lt.s32.totalorder (!%p174_p3), %s548_s16, 63  ;;  %v741_v9 = vld [vmem:[%s868_s2] ss:$0 sm:$0xff] (!%p174_p3) }
   0xe   : > { %s875_s16 = smov (!%p210_p4, %s548_s16), 63 }
   0xf   : > { %s549_s17 = sshll.u32 %s875_s16, 2  ;;  %s551_s25 = sshll.u32 %s875_s16, 3 }
  0x10   : > { %s727_s20 = scalar_lea.vmem %s866_s0, %s549_s17  ;;  %s759_s28 = scalar_lea.vmem %s869_s3, %s551_s25 }
  0x11   : > { %v557_v1 = vld [vmem:[%s727_s20] sm:$0xff]   ;;  %v620_v2 = vld [vmem:[%s727_s20 + $0x8] sm:$0xff]   ;;  %v621_v3 = vld [vmem:[%s727_s20 + $0x10] sm:$0xff]  }
  0x12   : > { %v558_v4 = vunpack.c.l.bf16 %v557_v1  ;;  %v559_v5 = vunpack.c.h.bf16 %v557_v1  ;;  %v562_v6 = vunpack.c.l.bf16 %v620_v2  ;;  %v563_v7 = vunpack.c.h.bf16 %v620_v2  ;;  %v622_v8 = vld [vmem:[%s727_s20 + $0x18] sm:$0xff]   ;;  %v623_v30 = vld [vmem:[%s727_s20 + $0x20] sm:$0xff]   ;;  %v624_v31 = vld [vmem:[%s727_s20 + $0x28] sm:$0xff]  }
  0x13   : > { %v566_v10 = vunpack.c.l.bf16 %v621_v3  ;;  %v567_v11 = vunpack.c.h.bf16 %v621_v3  ;;  %v570_v12 = vunpack.c.l.bf16 %v622_v8  ;;  %v571_v13 = vunpack.c.h.bf16 %v622_v8  ;;  %v625_v36 = vld [vmem:[%s727_s20 + $0x30] sm:$0xff]   ;;  %v626_v37 = vld [vmem:[%s727_s20 + $0x38] sm:$0xff]   ;;  %v627_v3 = vld [vmem:[%s727_s20 + $0x40] sm:$0xff]  }
  0x14   : > { %v304_v14 = vmul.f32 %v558_v4, %v732_v0  ;;  %v305_v15 = vmul.f32 %v559_v5, %v732_v0  ;;  %v306_v16 = vmul.f32 %v562_v6, %v732_v0  ;;  %v307_v17 = vmul.f32 %v563_v7, %v732_v0  ;;  %v628_v4 = vld [vmem:[%s727_s20 + $0x48] sm:$0xff]  }
  0x15   : > { %v308_v18 = vmul.f32 %v566_v10, %v732_v0  ;;  %v309_v19 = vmul.f32 %v567_v11, %v732_v0  ;;  %v310_v20 = vmul.f32 %v570_v12, %v732_v0  ;;  %v311_v21 = vmul.f32 %v571_v13, %v732_v0  ;;  %v629_v10 = vld [vmem:[%s727_s20 + $0x50] sm:$0xff]   ;;  %v630_v11 = vld [vmem:[%s727_s20 + $0x58] sm:$0xff]  }
  0x16   : > { %v343_v22 = vadd.f32 %v741_v9, %v304_v14  ;;  %v344_v23 = vadd.f32 %v741_v9, %v305_v15  ;;  %v345_v24 = vadd.f32 %v741_v9, %v306_v16  ;;  %v346_v25 = vadd.f32 %v741_v9, %v307_v17 }
  0x17   : > { %v347_v26 = vadd.f32 %v741_v9, %v308_v18  ;;  %v348_v27 = vadd.f32 %v741_v9, %v309_v19  ;;  %v349_v28 = vadd.f32 %v741_v9, %v310_v20  ;;  %v350_v29 = vadd.f32 %v741_v9, %v311_v21 }
  0x18   : > { %v375_v32 = vmax.f32 %v343_v22, 0.0  ;;  %v376_v33 = vmax.f32 %v344_v23, 0.0  ;;  %v377_v34 = vmax.f32 %v345_v24, 0.0  ;;  %v378_v35 = vmax.f32 %v346_v25, 0.0 }
  0x19   : > { %v379_v38 = vmax.f32 %v347_v26, 0.0  ;;  %v380_v39 = vmax.f32 %v348_v27, 0.0  ;;  %v381_v40 = vmax.f32 %v349_v28, 0.0  ;;  %v382_v41 = vmax.f32 %v350_v29, 0.0 }
  0x1a   : > { %407 = vst [vmem:[%s759_s28] sm:$0xff] %v375_v32  ;;  %408 = vst [vmem:[%s759_s28 + $0x8] sm:$0xff] %v376_v33  ;;  %v574_v42 = vunpack.c.l.bf16 %v623_v30  ;;  %v575_v43 = vunpack.c.h.bf16 %v623_v30  ;;  %v578_v44 = vunpack.c.l.bf16 %v624_v31  ;;  %v579_v45 = vunpack.c.h.bf16 %v624_v31 }
  0x1b   : > { %409 = vst [vmem:[%s759_s28 + $0x10] sm:$0xff] %v377_v34  ;;  %410 = vst [vmem:[%s759_s28 + $0x18] sm:$0xff] %v378_v35  ;;  %v582_v46 = vunpack.c.l.bf16 %v625_v36  ;;  %v583_v47 = vunpack.c.h.bf16 %v625_v36  ;;  %v586_v48 = vunpack.c.l.bf16 %v626_v37  ;;  %v587_v49 = vunpack.c.h.bf16 %v626_v37 }
  0x1c   : > { %411 = vst [vmem:[%s759_s28 + $0x20] sm:$0xff] %v379_v38  ;;  %412 = vst [vmem:[%s759_s28 + $0x28] sm:$0xff] %v380_v39  ;;  %v312_v50 = vmul.f32 %v574_v42, %v732_v0  ;;  %v313_v51 = vmul.f32 %v575_v43, %v732_v0  ;;  %v314_v52 = vmul.f32 %v578_v44, %v732_v0  ;;  %v590_v16 = vunpack.c.l.bf16 %v627_v3 }
  0x1d   : > { %413 = vst [vmem:[%s759_s28 + $0x30] sm:$0xff] %v381_v40  ;;  %414 = vst [vmem:[%s759_s28 + $0x38] sm:$0xff] %v382_v41  ;;  %v315_v53 = vmul.f32 %v579_v45, %v732_v0  ;;  %v316_v54 = vmul.f32 %v582_v46, %v732_v0  ;;  %v317_v55 = vmul.f32 %v583_v47, %v732_v0  ;;  %v591_v17 = vunpack.c.h.bf16 %v627_v3  ;;  %v631_v40 = vld [vmem:[%s727_s20 + $0x60] sm:$0xff]   ;;  %v632_v41 = vld [vmem:[%s727_s20 + $0x68] sm:$0xff]  }
  0x1e   : > { %v318_v56 = vmul.f32 %v586_v48, %v732_v0  ;;  %v319_v57 = vmul.f32 %v587_v49, %v732_v0  ;;  %v351_v58 = vadd.f32 %v741_v9, %v312_v50  ;;  %v352_v59 = vadd.f32 %v741_v9, %v313_v51  ;;  %v633_v46 = vld [vmem:[%s727_s20 + $0x70] sm:$0xff]   ;;  %v634_v47 = vld [vmem:[%s727_s20 + $0x78] sm:$0xff]  }
  0x1f   : > { %v353_v60 = vadd.f32 %v741_v9, %v314_v52  ;;  %v354_v61 = vadd.f32 %v741_v9, %v315_v53  ;;  %v355_v62 = vadd.f32 %v741_v9, %v316_v54  ;;  %v356_v63 = vadd.f32 %v741_v9, %v317_v55 }
  0x20   : > { %v357_v1 = vadd.f32 %v741_v9, %v318_v56  ;;  %v358_v2 = vadd.f32 %v741_v9, %v319_v57  ;;  %v383_v5 = vmax.f32 %v351_v58, 0.0  ;;  %v384_v6 = vmax.f32 %v352_v59, 0.0 }
  0x21   : > { %v385_v7 = vmax.f32 %v353_v60, 0.0  ;;  %v386_v8 = vmax.f32 %v354_v61, 0.0  ;;  %v387_v12 = vmax.f32 %v355_v62, 0.0  ;;  %v388_v13 = vmax.f32 %v356_v63, 0.0 }
  0x22   : > { %v389_v14 = vmax.f32 %v357_v1, 0.0  ;;  %v390_v15 = vmax.f32 %v358_v2, 0.0  ;;  %415 = vst [vmem:[%s759_s28 + $0x40] sm:$0xff] %v383_v5  ;;  %416 = vst [vmem:[%s759_s28 + $0x48] sm:$0xff] %v384_v6  ;;  %v594_v18 = vunpack.c.l.bf16 %v628_v4  ;;  %v595_v19 = vunpack.c.h.bf16 %v628_v4 }
  0x23   : > { %417 = vst [vmem:[%s759_s28 + $0x50] sm:$0xff] %v385_v7  ;;  %418 = vst [vmem:[%s759_s28 + $0x58] sm:$0xff] %v386_v8  ;;  %v598_v20 = vunpack.c.l.bf16 %v629_v10  ;;  %v599_v21 = vunpack.c.h.bf16 %v629_v10  ;;  %v602_v22 = vunpack.c.l.bf16 %v630_v11  ;;  %v603_v23 = vunpack.c.h.bf16 %v630_v11 }
  0x24   : > { %419 = vst [vmem:[%s759_s28 + $0x60] sm:$0xff] %v387_v12  ;;  %420 = vst [vmem:[%s759_s28 + $0x68] sm:$0xff] %v388_v13  ;;  %v320_v24 = vmul.f32 %v590_v16, %v732_v0  ;;  %v321_v25 = vmul.f32 %v591_v17, %v732_v0  ;;  %v322_v26 = vmul.f32 %v594_v18, %v732_v0  ;;  %v606_v52 = vunpack.c.l.bf16 %v631_v40 }
  0x25   : > { %421 = vst [vmem:[%s759_s28 + $0x70] sm:$0xff] %v389_v14  ;;  %422 = vst [vmem:[%s759_s28 + $0x78] sm:$0xff] %v390_v15  ;;  %v323_v27 = vmul.f32 %v595_v19, %v732_v0  ;;  %v324_v28 = vmul.f32 %v598_v20, %v732_v0  ;;  %v325_v29 = vmul.f32 %v599_v21, %v732_v0  ;;  %v607_v53 = vunpack.c.h.bf16 %v631_v40 }
  0x26   : > { %v326_v30 = vmul.f32 %v602_v22, %v732_v0  ;;  %v327_v31 = vmul.f32 %v603_v23, %v732_v0  ;;  %v359_v32 = vadd.f32 %v741_v9, %v320_v24  ;;  %v360_v33 = vadd.f32 %v741_v9, %v321_v25 }
  0x27   : > { %v361_v34 = vadd.f32 %v741_v9, %v322_v26  ;;  %v362_v35 = vadd.f32 %v741_v9, %v323_v27  ;;  %v363_v36 = vadd.f32 %v741_v9, %v324_v28  ;;  %v364_v37 = vadd.f32 %v741_v9, %v325_v29 }
  0x28   : > { %v365_v38 = vadd.f32 %v741_v9, %v326_v30  ;;  %v366_v39 = vadd.f32 %v741_v9, %v327_v31  ;;  %v391_v42 = vmax.f32 %v359_v32, 0.0  ;;  %v392_v43 = vmax.f32 %v360_v33, 0.0 }
  0x29   : > { %v393_v44 = vmax.f32 %v361_v34, 0.0  ;;  %v394_v45 = vmax.f32 %v362_v35, 0.0  ;;  %v395_v48 = vmax.f32 %v363_v36, 0.0  ;;  %v396_v49 = vmax.f32 %v364_v37, 0.0 }
  0x2a   : > { %v397_v50 = vmax.f32 %v365_v38, 0.0  ;;  %v398_v51 = vmax.f32 %v366_v39, 0.0  ;;  %423 = vst [vmem:[%s759_s28 + $0x80] sm:$0xff] %v391_v42  ;;  %424 = vst [vmem:[%s759_s28 + $0x88] sm:$0xff] %v392_v43  ;;  %v610_v54 = vunpack.c.l.bf16 %v632_v41  ;;  %v611_v55 = vunpack.c.h.bf16 %v632_v41 }
  0x2b   : > { %425 = vst [vmem:[%s759_s28 + $0x90] sm:$0xff] %v393_v44  ;;  %426 = vst [vmem:[%s759_s28 + $0x98] sm:$0xff] %v394_v45  ;;  %v614_v56 = vunpack.c.l.bf16 %v633_v46  ;;  %v615_v57 = vunpack.c.h.bf16 %v633_v46  ;;  %v618_v58 = vunpack.c.l.bf16 %v634_v47  ;;  %v619_v59 = vunpack.c.h.bf16 %v634_v47 }
  0x2c   : > { %427 = vst [vmem:[%s759_s28 + $0xa0] sm:$0xff] %v395_v48  ;;  %428 = vst [vmem:[%s759_s28 + $0xa8] sm:$0xff] %v396_v49  ;;  %v328_v60 = vmul.f32 %v606_v52, %v732_v0  ;;  %v329_v61 = vmul.f32 %v607_v53, %v732_v0  ;;  %v330_v62 = vmul.f32 %v610_v54, %v732_v0 }
  0x2d   : > { %429 = vst [vmem:[%s759_s28 + $0xb0] sm:$0xff] %v397_v50  ;;  %430 = vst [vmem:[%s759_s28 + $0xb8] sm:$0xff] %v398_v51  ;;  %v331_v63 = vmul.f32 %v611_v55, %v732_v0  ;;  %v332_v1 = vmul.f32 %v614_v56, %v732_v0  ;;  %v333_v2 = vmul.f32 %v615_v57, %v732_v0 }
  0x2e   : > { %v334_v3 = vmul.f32 %v618_v58, %v732_v0  ;;  %v335_v4 = vmul.f32 %v619_v59, %v732_v0  ;;  %v367_v5 = vadd.f32 %v741_v9, %v328_v60  ;;  %v368_v6 = vadd.f32 %v741_v9, %v329_v61 }
  0x2f   : > { %v369_v7 = vadd.f32 %v741_v9, %v330_v62  ;;  %v370_v8 = vadd.f32 %v741_v9, %v331_v63  ;;  %v371_v10 = vadd.f32 %v741_v9, %v332_v1  ;;  %v372_v11 = vadd.f32 %v741_v9, %v333_v2 }
  0x30   : > { %v373_v0 = vadd.f32 %v741_v9, %v334_v3  ;;  %v374_v12 = vadd.f32 %v741_v9, %v335_v4  ;;  %v399_v13 = vmax.f32 %v367_v5, 0.0  ;;  %v400_v14 = vmax.f32 %v368_v6, 0.0 }
  0x31   : > { %v401_v15 = vmax.f32 %v369_v7, 0.0  ;;  %v402_v16 = vmax.f32 %v370_v8, 0.0  ;;  %v403_v17 = vmax.f32 %v371_v10, 0.0  ;;  %v404_v18 = vmax.f32 %v372_v11, 0.0 }
  0x32   : > { %v405_v19 = vmax.f32 %v373_v0, 0.0  ;;  %v406_v20 = vmax.f32 %v374_v12, 0.0  ;;  %431 = vst [vmem:[%s759_s28 + $0xc0] sm:$0xff] %v399_v13  ;;  %432 = vst [vmem:[%s759_s28 + $0xc8] sm:$0xff] %v400_v14 }
  0x33   : > { %433 = vst [vmem:[%s759_s28 + $0xd0] sm:$0xff] %v401_v15  ;;  %434 = vst [vmem:[%s759_s28 + $0xd8] sm:$0xff] %v402_v16 }
  0x34   : > { %435 = vst [vmem:[%s759_s28 + $0xe0] sm:$0xff] %v403_v17  ;;  %436 = vst [vmem:[%s759_s28 + $0xe8] sm:$0xff] %v404_v18 }
  0x35   : > { %437 = vst [vmem:[%s759_s28 + $0xf0] sm:$0xff] %v405_v19  ;;  %438 = vst [vmem:[%s759_s28 + $0xf8] sm:$0xff] %v406_v20 }
  0x36 PF: > { %s13_s14 = sadd.s32 1, %s681_s14   ;;  %s870_s12 = smov %s677_s13 }
  0x37   : > { %p10_p5 = scmp.ge.s32.totalorder %s13_s14, 4   ;;  %s871_s13 = smov %s873_s15 }
  0x39   :  { %12 = sbr.rel (!%p10_p5) target bundleno = 2 (0x2), region = 68 }

// kernel: conv_bn_relu_forward.2
= control target key start
LH: loop header
LB: loop body
LE: loop exit
PB: predicated region body
PF: predicated region fallthrough
CT: control target
= control target key end

     0   :  { %s1433_s15 = smov 0   ;;  %s1435_s16 = smov 0   ;;  %s1628_s0 = inlined_call_operand.vmem [shape: bf16[512,128], index: 0, kind: input, shape index: {}]   ;;  %s1629_s1 = inlined_call_operand.vmem [shape: bf16[128,128], index: 1, kind: input, shape index: {}]   ;;  %s1630_s2 = inlined_call_operand.vmem [shape: bf16[512,128], index: 2, kind: output, shape index: {0}]   ;;  %s1631_s3 = inlined_call_operand.vmem [shape: f32[2,1,128], index: 3, kind: output, shape index: {1}]   ;;  %s1632_s4 = inlined_call_operand.vmem [shape: f32[2,1,128], index: 4, kind: output, shape index: {2}]  }
   0x1   :  { %s1437_s17 = smov 0  }
   0x2 LB: > { %s27_s18 = sadd.s32 1, %s1402_s16  ;;  %p1058_p0 = scmp.ge.s32.totalorder %s1406_s17, 1  ;;  %s1406_s17 = sphi %s1437_s17, %s15_s17   ;;  %s1402_s16 = sphi %s1435_s16, %s1634_s16   ;;  %s1398_s15 = sphi %s1433_s15, %s1633_s15  }
   0x3   : > { %p29_p1 = scmp.ge.s32.totalorder %s27_s18, 2  ;;  %p195_p2 = scmp.lt.s32.totalorder %s1406_s17, 3 }
   0x5   : > { %s1636_s18 = smov (%p29_p1, %s27_s18), 0  ;;  %p196_p3 = pnand %p1058_p0, %p195_p2 }
   0x6   : > { %v1360_v0 = vld [vmem:[%s1629_s1] sm:$0xff] (!%p196_p3)   ;;  %s1059_s21 = sshll.u32 (!%p196_p3), %s1398_s15, 5  ;;  %v1361_v1 = vld [vmem:[%s1629_s1 + $0x8] sm:$0xff] (!%p196_p3)   ;;  %v1362_v2 = vld [vmem:[%s1629_s1 + $0x10] sm:$0xff] (!%p196_p3)   ;;  %p259_p5 = scmp.lt.s32.totalorder (!%p196_p3), %s1398_s15, 1 }
   0x7   : > { %199 = sbr.rel (%p196_p3) target bundleno = 331 (0x14b), region = 28  ;;  %p241_p4 = scmp.lt.s32.totalorder (!%p196_p3), %s1059_s21, 63  ;;  %1272 = vmatprep.subr.bf16.mxu0 (!%p196_p3), %v1360_v0  ;;  %1320 = vmatprep.subr.bf16.mxu1 (!%p196_p3), %v1360_v0  ;;  %v1363_v3 = vld [vmem:[%s1629_s1 + $0x18] sm:$0xff] (!%p196_p3)   ;;  %v1364_v5 = vld [vmem:[%s1629_s1 + $0x20] sm:$0xff] (!%p196_p3)   ;;  %v1365_v6 = vld [vmem:[%s1629_s1 + $0x28] sm:$0xff] (!%p196_p3)  }
   0x8   : > { %1273 = vmatpush3.bf16.msra.mxu0 (!%p196_p3), %v1360_v0  ;;  %1328 = vmatpush3.bf16.msra.mxu1 (!%p196_p3), %v1360_v0  ;;  %v1366_v8 = vld [vmem:[%s1629_s1 + $0x30] sm:$0xff] (!%p196_p3)   ;;  %v1367_v9 = vld [vmem:[%s1629_s1 + $0x38] sm:$0xff] (!%p196_p3)  }
   0x9   : > { %1274 = vmatprep.subr.bf16.mxu0 (!%p196_p3), %v1361_v1  ;;  %1321 = vmatprep.subr.bf16.mxu1 (!%p196_p3), %v1361_v1 }
   0xc   : > { %1275 = vmatpush3.bf16.msra.mxu0 (!%p196_p3), %v1361_v1  ;;  %1329 = vmatpush3.bf16.msra.mxu1 (!%p196_p3), %v1361_v1 }
   0xd   : > { %1276 = vmatprep.subr.bf16.mxu0 (!%p196_p3), %v1362_v2  ;;  %1322 = vmatprep.subr.bf16.mxu1 (!%p196_p3), %v1362_v2 }
   0xe   : > { %s1638_s21 = smov (!%p241_p4, %s1059_s21), 63  ;;  %s1640_s15 = smov (!%p259_p5, %s1398_s15), 1 }
   0xf   : > { %s1060_s26 = sshll.u32 %s1638_s21, 2  ;;  %s264_s23 = scalar_lea.vmem %s1631_s3, %s1640_s15 }
  0x10   : > { %s1471_s29 = scalar_lea.vmem %s1628_s0, %s1060_s26  ;;  %1277 = vmatpush3.bf16.msra.mxu0 %v1362_v2  ;;  %1330 = vmatpush3.bf16.msra.mxu1 %v1362_v2  ;;  %s1513_s20 = scalar_lea.vmem %s1630_s2, %s1060_s26 }
  0x11   : > { %v1368_v4 = vld [vmem:[%s1471_s29] sm:$0xff]   ;;  %1278 = vmatprep.subr.bf16.mxu0 %v1363_v3  ;;  %1323 = vmatprep.subr.bf16.mxu1 %v1363_v3  ;;  %v1369_v10 = vld [vmem:[%s1471_s29 + $0x8] sm:$0xff]   ;;  %v1370_v12 = vld [vmem:[%s1471_s29 + $0x10] sm:$0xff]   ;;  %s270_s26 = scalar_lea.vmem %s1632_s4, %s1640_s15 }
  0x12   : > { %1288 = vmatprep.mubr.bf16.mxu0 %v1368_v4  ;;  %v1376_v7 = vld [vmem:[%s1471_s29 + $0x40] sm:$0xff]   ;;  %v1377_v11 = vld [vmem:[%s1471_s29 + $0x48] sm:$0xff]   ;;  %v1378_v13 = vld [vmem:[%s1471_s29 + $0x50] sm:$0xff]  }
  0x13   : > { %1304 = vmatprep.mubr.bf16.mxu1 %v1376_v7  ;;  %v1371_v14 = vld [vmem:[%s1471_s29 + $0x18] sm:$0xff]   ;;  %v1372_v16 = vld [vmem:[%s1471_s29 + $0x20] sm:$0xff]   ;;  %v1373_v18 = vld [vmem:[%s1471_s29 + $0x28] sm:$0xff]  }
  0x14   : > { %1279 = vmatpush3.bf16.msra.mxu0 %v1363_v3  ;;  %1331 = vmatpush3.bf16.msra.mxu1 %v1363_v3  ;;  %v1379_v15 = vld [vmem:[%s1471_s29 + $0x58] sm:$0xff]   ;;  %v1380_v17 = vld [vmem:[%s1471_s29 + $0x60] sm:$0xff]   ;;  %v1381_v19 = vld [vmem:[%s1471_s29 + $0x68] sm:$0xff]  }
  0x15   : > { %1280 = vmatprep.subr.bf16.mxu0 %v1364_v5  ;;  %1324 = vmatprep.subr.bf16.mxu1 %v1364_v5  ;;  %v1374_v20 = vld [vmem:[%s1471_s29 + $0x30] sm:$0xff]   ;;  %v1375_v22 = vld [vmem:[%s1471_s29 + $0x38] sm:$0xff]  }
  0x16   : > { %v1382_v21 = vld [vmem:[%s1471_s29 + $0x70] sm:$0xff]   ;;  %v1383_v23 = vld [vmem:[%s1471_s29 + $0x78] sm:$0xff]  }
  0x18   : > { %1281 = vmatpush3.bf16.msra.mxu0 %v1364_v5  ;;  %1332 = vmatpush3.bf16.msra.mxu1 %v1364_v5 }
  0x19   : > { %1282 = vmatprep.subr.bf16.mxu0 %v1365_v6  ;;  %1325 = vmatprep.subr.bf16.mxu1 %v1365_v6 }
  0x1c   : > { %1283 = vmatpush3.bf16.msra.mxu0 %v1365_v6  ;;  %1333 = vmatpush3.bf16.msra.mxu1 %v1365_v6 }
  0x1d   : > { %1284 = vmatprep.subr.bf16.mxu0 %v1366_v8  ;;  %1326 = vmatprep.subr.bf16.mxu1 %v1366_v8 }
  0x20   : > { %1285 = vmatpush3.bf16.msra.mxu0 %v1366_v8  ;;  %1334 = vmatpush3.bf16.msra.mxu1 %v1366_v8 }
  0x21   : > { %1286 = vmatprep.subr.bf16.mxu0 %v1367_v9  ;;  %1327 = vmatprep.subr.bf16.mxu1 %v1367_v9 }
  0x24   : > { %1287 = vmatpush3.bf16.msra.mxu0 %v1367_v9  ;;  %1335 = vmatpush3.bf16.msra.mxu1 %v1367_v9 }
  0x27   : > { %1289 = vmatmul.mubr.bf16.vlgmr.msra.gmra.mrb[0].mxu0 %v1369_v10  ;;  %1305 = vmatmul.mubr.bf16.vlgmr.msra.gmra.mrb[0].mxu1 %v1377_v11 }
  0x28   : > { %1292 = vmatprep.mubr.bf16.mxu0 %v1370_v12  ;;  %1308 = vmatprep.mubr.bf16.mxu1 %v1378_v13 }
  0x2f   : > { %1293 = vmatmul.mubr.bf16.gmra.mrb[4].mxu0 %v1371_v14  ;;  %1309 = vmatmul.mubr.bf16.gmra.mrb[4].mxu1 %v1379_v15 }
  0x30   : > { %1296 = vmatprep.mubr.bf16.mxu0 %v1372_v16  ;;  %1312 = vmatprep.mubr.bf16.mxu1 %v1380_v17 }
  0x37   : > { %1297 = vmatmul.mubr.bf16.gmra.mrb[8].mxu0 %v1373_v18  ;;  %1313 = vmatmul.mubr.bf16.gmra.mrb[8].mxu1 %v1381_v19 }
  0x38   : > { %1300 = vmatprep.mubr.bf16.mxu0 %v1374_v20  ;;  %1316 = vmatprep.mubr.bf16.mxu1 %v1382_v21 }
  0x3f   : > { %1301 = vmatmul.mubr.bf16.gmra.mrb[12].mxu0 %v1375_v22  ;;  %1317 = vmatmul.mubr.bf16.gmra.mrb[12].mxu1 %v1383_v23 }
  0xfa   : > { %v1290_v24 = vpop.f32.mrb[0].mxu0  ;;  %v1504_v25 = vpop.f32.mrb[0].mxu1 }
  0xfb   : > { %v498_v26 = vpop.f32.mrb[1].mxu0  ;;  %v1506_v27 = vpop.f32.mrb[1].mxu1  ;;  %v825_v39 = vmul.f32 %v1290_v24, %v1290_v24 }
  0xfc   : > { %v1291_v28 = vpop.f32.mrb[2].mxu0  ;;  %v1515_v29 = vpop.f32.mrb[2].mxu1  ;;  %v823_v30 = vmul.f32 %v498_v26, %v498_v26 }
  0xfd   : > { %v1161_v31 = vpack.c.bf16 %v1291_v28, %v1290_v24  ;;  %v501_v32 = vpop.f32.mrb[3].mxu0  ;;  %v1201_v33 = vpack.c.bf16 %v1515_v29, %v1504_v25  ;;  %v1519_v34 = vpop.f32.mrb[3].mxu1  ;;  %v826_v42 = vmul.f32 %v1291_v28, %v1291_v28 }
  0xfe   : > { %v1156_v35 = vpack.c.bf16 %v501_v32, %v498_v26  ;;  %v785_v36 = vadd.f32 %v501_v32, %v498_v26  ;;  %v824_v37 = vmul.f32 %v501_v32, %v501_v32  ;;  %v1196_v38 = vpack.c.bf16 %v1519_v34, %v1506_v27 }
  0xff   : > { %1233 = vst [vmem:[%s1513_s20 + $0x8] sm:$0xff] %v1161_v31   ;;  %1241 = vst [vmem:[%s1513_s20 + $0x48] sm:$0xff] %v1201_v33  }
 0x100   : > { %1157 = vst [vmem:[%s1513_s20] sm:$0xff] %v1156_v35   ;;  %v786_v40 = vadd.f32 %v1290_v24, %v785_v36  ;;  %v855_v41 = vadd.f32 %v824_v37, %v823_v30  ;;  %1240 = vst [vmem:[%s1513_s20 + $0x40] sm:$0xff] %v1196_v38  }
 0x102   : > { %v856_v43 = vadd.f32 %v855_v41, %v825_v39  ;;  %v1294_v44 = vpop.f32.mrb[4].mxu0  ;;  %v787_v45 = vadd.f32 %v1291_v28, %v786_v40  ;;  %v1527_v46 = vpop.f32.mrb[4].mxu1 }
 0x103   : > { %v514_v47 = vpop.f32.mrb[5].mxu0  ;;  %v1529_v48 = vpop.f32.mrb[5].mxu1  ;;  %v829_v63 = vmul.f32 %v1294_v44, %v1294_v44 }
 0x104   : > { %v788_v49 = vadd.f32 %v787_v45, %v514_v47  ;;  %v827_v50 = vmul.f32 %v514_v47, %v514_v47  ;;  %v857_v51 = vadd.f32 %v856_v43, %v826_v42  ;;  %v1295_v52 = vpop.f32.mrb[6].mxu0  ;;  %v1531_v53 = vpop.f32.mrb[6].mxu1 }
 0x105   : > { %v1171_v54 = vpack.c.bf16 %v1295_v52, %v1294_v44  ;;  %v517_v55 = vpop.f32.mrb[7].mxu0  ;;  %v1211_v56 = vpack.c.bf16 %v1531_v53, %v1527_v46  ;;  %v1535_v57 = vpop.f32.mrb[7].mxu1  ;;  %v830_v2 = vmul.f32 %v1295_v52, %v1295_v52 }
 0x106   : > { %v858_v58 = vadd.f32 %v857_v51, %v827_v50  ;;  %v1166_v59 = vpack.c.bf16 %v517_v55, %v514_v47  ;;  %v789_v60 = vadd.f32 %v788_v49, %v517_v55  ;;  %v828_v61 = vmul.f32 %v517_v55, %v517_v55 }
 0x107   : > { %1235 = vst [vmem:[%s1513_s20 + $0x18] sm:$0xff] %v1171_v54   ;;  %1243 = vst [vmem:[%s1513_s20 + $0x58] sm:$0xff] %v1211_v56   ;;  %v1206_v62 = vpack.c.bf16 %v1535_v57, %v1529_v48 }
 0x108   : > { %1234 = vst [vmem:[%s1513_s20 + $0x10] sm:$0xff] %v1166_v59   ;;  %v790_v0 = vadd.f32 %v1294_v44, %v789_v60  ;;  %v859_v1 = vadd.f32 %v858_v58, %v828_v61  ;;  %v839_v61 = vmul.f32 %v1506_v27, %v1506_v27 }
 0x109   : > { %1242 = vst [vmem:[%s1513_s20 + $0x50] sm:$0xff] %v1206_v62  }
 0x10a   : > { %v860_v3 = vadd.f32 %v859_v1, %v829_v63  ;;  %v1298_v4 = vpop.f32.mrb[8].mxu0  ;;  %v791_v5 = vadd.f32 %v1295_v52, %v790_v0  ;;  %v1543_v6 = vpop.f32.mrb[8].mxu1 }
 0x10b   : > { %v530_v7 = vpop.f32.mrb[9].mxu0  ;;  %v1545_v8 = vpop.f32.mrb[9].mxu1  ;;  %v833_v23 = vmul.f32 %v1298_v4, %v1298_v4 }
 0x10c   : > { %v792_v9 = vadd.f32 %v791_v5, %v530_v7  ;;  %v831_v10 = vmul.f32 %v530_v7, %v530_v7  ;;  %v861_v11 = vadd.f32 %v860_v3, %v830_v2  ;;  %v1299_v12 = vpop.f32.mrb[10].mxu0  ;;  %v1547_v13 = vpop.f32.mrb[10].mxu1  ;;  %v840_v2 = vmul.f32 %v1519_v34, %v1519_v34 }
 0x10d   : > { %v1181_v14 = vpack.c.bf16 %v1299_v12, %v1298_v4  ;;  %v533_v15 = vpop.f32.mrb[11].mxu0  ;;  %v1221_v16 = vpack.c.bf16 %v1547_v13, %v1543_v6  ;;  %v1551_v17 = vpop.f32.mrb[11].mxu1  ;;  %v834_v28 = vmul.f32 %v1299_v12, %v1299_v12  ;;  %v841_v3 = vmul.f32 %v1504_v25, %v1504_v25 }
 0x10e   : > { %v862_v18 = vadd.f32 %v861_v11, %v831_v10  ;;  %v1176_v19 = vpack.c.bf16 %v533_v15, %v530_v7  ;;  %v793_v20 = vadd.f32 %v792_v9, %v533_v15  ;;  %v832_v21 = vmul.f32 %v533_v15, %v533_v15 }
 0x10f   : > { %1237 = vst [vmem:[%s1513_s20 + $0x28] sm:$0xff] %v1181_v14   ;;  %1245 = vst [vmem:[%s1513_s20 + $0x68] sm:$0xff] %v1221_v16   ;;  %v1216_v22 = vpack.c.bf16 %v1551_v17, %v1545_v8  ;;  %v842_v7 = vmul.f32 %v1515_v29, %v1515_v29  ;;  %v844_v15 = vmul.f32 %v1535_v57, %v1535_v57 }
 0x110   : > { %1236 = vst [vmem:[%s1513_s20 + $0x20] sm:$0xff] %v1176_v19   ;;  %v794_v24 = vadd.f32 %v1298_v4, %v793_v20  ;;  %v863_v26 = vadd.f32 %v862_v18, %v832_v21 }
 0x111   : > { %1244 = vst [vmem:[%s1513_s20 + $0x60] sm:$0xff] %v1216_v22  }
 0x112   : > { %v864_v30 = vadd.f32 %v863_v26, %v833_v23  ;;  %v1302_v31 = vpop.f32.mrb[12].mxu0  ;;  %v795_v32 = vadd.f32 %v1299_v12, %v794_v24  ;;  %v1559_v33 = vpop.f32.mrb[12].mxu1  ;;  %v848_v24 = vmul.f32 %v1551_v17, %v1551_v17 }
 0x113   : > { %v546_v35 = vpop.f32.mrb[13].mxu0  ;;  %v610_v36 = vpop.f32.mrb[13].mxu1  ;;  %v837_v54 = vmul.f32 %v1302_v31, %v1302_v31 }
 0x114   : > { %v796_v37 = vadd.f32 %v795_v32, %v546_v35  ;;  %v835_v38 = vmul.f32 %v546_v35, %v546_v35  ;;  %v865_v39 = vadd.f32 %v864_v30, %v834_v28  ;;  %v1303_v40 = vpop.f32.mrb[14].mxu0  ;;  %v1561_v41 = vpop.f32.mrb[14].mxu1 }
 0x115   : > { %v1191_v42 = vpack.c.bf16 %v1303_v40, %v1302_v31  ;;  %v549_v43 = vpop.f32.mrb[15].mxu0  ;;  %v1231_v44 = vpack.c.bf16 %v1561_v41, %v1559_v33  ;;  %v613_v45 = vpop.f32.mrb[15].mxu1  ;;  %v838_v58 = vmul.f32 %v1303_v40, %v1303_v40 }
 0x116   : > { %v866_v47 = vadd.f32 %v865_v39, %v835_v38  ;;  %v1186_v49 = vpack.c.bf16 %v549_v43, %v546_v35  ;;  %v797_v50 = vadd.f32 %v796_v37, %v549_v43  ;;  %v836_v51 = vmul.f32 %v549_v43, %v549_v43 }
 0x117   : > { %1239 = vst [vmem:[%s1513_s20 + $0x38] sm:$0xff] %v1191_v42   ;;  %1247 = vst [vmem:[%s1513_s20 + $0x78] sm:$0xff] %v1231_v44   ;;  %v1226_v52 = vpack.c.bf16 %v613_v45, %v610_v36  ;;  %v853_v39 = vmul.f32 %v1559_v33, %v1559_v33  ;;  %v854_v42 = vmul.f32 %v1561_v41, %v1561_v41 }
 0x118   : > { %1238 = vst [vmem:[%s1513_s20 + $0x30] sm:$0xff] %v1186_v49   ;;  %v798_v55 = vadd.f32 %v1302_v31, %v797_v50  ;;  %v867_v56 = vadd.f32 %v866_v47, %v836_v51  ;;  %v851_v31 = vmul.f32 %v610_v36, %v610_v36 }
 0x119   : > { %1246 = vst [vmem:[%s1513_s20 + $0x70] sm:$0xff] %v1226_v52  }
 0x11a   : > { %v868_v59 = vadd.f32 %v867_v56, %v837_v54  ;;  %v799_v60 = vadd.f32 %v1303_v40, %v798_v55 }
 0x11c   : > { %v800_v62 = vadd.f32 %v799_v60, %v1506_v27  ;;  %v869_v63 = vadd.f32 %v868_v59, %v838_v58  ;;  %v843_v27 = vmul.f32 %v1529_v48, %v1529_v48 }
 0x11e   : > { %v870_v0 = vadd.f32 %v869_v63, %v839_v61  ;;  %v801_v1 = vadd.f32 %v800_v62, %v1519_v34 }
 0x120   : > { %v802_v4 = vadd.f32 %v1504_v25, %v801_v1  ;;  %v871_v5 = vadd.f32 %v870_v0, %v840_v2  ;;  %v845_v25 = vmul.f32 %v1527_v46, %v1527_v46 }
 0x122   : > { %v872_v9 = vadd.f32 %v871_v5, %v841_v3  ;;  %v803_v10 = vadd.f32 %v1515_v29, %v802_v4  ;;  %v846_v29 = vmul.f32 %v1531_v53, %v1531_v53 }
 0x124   : > { %v804_v11 = vadd.f32 %v803_v10, %v1529_v48  ;;  %v873_v12 = vadd.f32 %v872_v9, %v842_v7  ;;  %v847_v48 = vmul.f32 %v1545_v8, %v1545_v8 }
 0x126   : > { %v874_v14 = vadd.f32 %v873_v12, %v843_v27  ;;  %v805_v34 = vadd.f32 %v804_v11, %v1535_v57 }
 0x128   : > { %v806_v16 = vadd.f32 %v1527_v46, %v805_v34  ;;  %v875_v18 = vadd.f32 %v874_v14, %v844_v15  ;;  %v849_v46 = vmul.f32 %v1543_v6, %v1543_v6 }
 0x12a   : > { %v876_v19 = vadd.f32 %v875_v18, %v845_v25  ;;  %v807_v20 = vadd.f32 %v1531_v53, %v806_v16  ;;  %v850_v53 = vmul.f32 %v1547_v13, %v1547_v13 }
 0x12c   : > { %v808_v21 = vadd.f32 %v807_v20, %v1545_v8  ;;  %v877_v22 = vadd.f32 %v876_v19, %v846_v29 }
 0x12e   : > { %v878_v23 = vadd.f32 %v877_v22, %v847_v48  ;;  %v809_v57 = vadd.f32 %v808_v21, %v1551_v17  ;;  %v852_v17 = vmul.f32 %v613_v45, %v613_v45 }
 0x130   : > { %v810_v26 = vadd.f32 %v1543_v6, %v809_v57  ;;  %v879_v28 = vadd.f32 %v878_v23, %v848_v24 }
 0x132   : > { %v880_v30 = vadd.f32 %v879_v28, %v849_v46  ;;  %v811_v8 = vadd.f32 %v1547_v13, %v810_v26 }
 0x134   : > { %v812_v32 = vadd.f32 %v811_v8, %v610_v36  ;;  %v881_v35 = vadd.f32 %v880_v30, %v850_v53 }
 0x136   : > { %v882_v37 = vadd.f32 %v881_v35, %v851_v31  ;;  %v813_v38 = vadd.f32 %v812_v32, %v613_v45 }
 0x138   : > { %v814_v6 = vadd.f32 %v1559_v33, %v813_v38  ;;  %v883_v40 = vadd.f32 %v882_v37, %v852_v17 }
 0x13a   : > { %v815_v43 = vadd.f32 %v1561_v41, %v814_v6  ;;  %v884_v44 = vadd.f32 %v883_v40, %v853_v39 }
 0x13c   : > { %v816_v13 = vrot.slane %v815_v43, 4  ;;  %v885_v47 = vadd.f32 %v884_v44, %v854_v42 }
 0x13e   : > { %v817_v36 = vadd.f32 %v816_v13, %v815_v43  ;;  %v886_v49 = vrot.slane %v885_v47, 4 }
 0x140   : > { %v818_v50 = vrot.slane %v817_v36, 2  ;;  %v887_v51 = vadd.f32 %v886_v49, %v885_v47 }
 0x142   : > { %v819_v45 = vadd.f32 %v818_v50, %v817_v36  ;;  %v888_v52 = vrot.slane %v887_v51, 2 }
 0x144   : > { %v820_v54 = vrot.slane %v819_v45, 1  ;;  %v889_v55 = vadd.f32 %v888_v52, %v887_v51 }
 0x146   : > { %v821_v33 = vadd.f32 %v820_v54, %v819_v45  ;;  %v890_v56 = vrot.slane %v889_v55, 1 }
 0x148   : > { %822 = vst [vmem:[%s264_s23] sm:$0x1] %v821_v33  ;;  %v891_v41 = vadd.f32 %v890_v56, %v889_v55 }
 0x14a   : > { %892 = vst [vmem:[%s270_s26] sm:$0x1] %v891_v41 }
 0x14b PF: > { %s15_s17 = sadd.s32 1, %s1406_s17   ;;  %s1633_s15 = smov %s1402_s16 }
 0x14c   : > { %p12_p6 = scmp.ge.s32.totalorder %s15_s17, 4   ;;  %s1634_s16 = smov %s1636_s18 }
 0x14e   :  { %14 = sbr.rel (!%p12_p6) target bundleno = 2 (0x2), region = 85 }

</bundles_post_ra>
